<compile_context>
chip_gen: v5e
topology: v5e:2x2
jax: 0.10.0
libtpu: 0.0.40
codegen_flags: <defaults>
</compile_context>

<pallas_src>
import jax
import jax.numpy as jnp
from jax.experimental import pallas as pl
from jax.experimental.pallas import tpu as pltpu


# -----------------------------------------------------------------------------
# Kernel
# -----------------------------------------------------------------------------
def linear_model_kernel(x_ref,
                        w1_ref, b1_ref, w2_ref, b2_ref, w3_ref, b3_ref,
                        w4_ref, b4_ref, w5_ref, b5_ref,
                        out_ref):
    """One (TB, n_in) f32 batch tile -> (TB, n_out) f32 output tile.

    Every dot runs on the MXU with bf16 operands and f32 accumulation
    (preferred_element_type); biases, ReLU and the residual adds stay in f32
    on the VPU (v5e has no bf16 VPU path).
    """
    def dot(a, w_ref):
        return jnp.dot(a.astype(w_ref.dtype), w_ref[...],
                       preferred_element_type=jnp.float32)

    x = x_ref[...]                                             # (TB, n_in) f32
    h = jnp.maximum(dot(x, w1_ref) + b1_ref[...], 0.0)         # (TB, H)  f32
    h = h + jnp.maximum(dot(h, w2_ref) + b2_ref[...], 0.0)
    h = h + jnp.maximum(dot(h, w3_ref) + b3_ref[...], 0.0)
    h = h + jnp.maximum(dot(h, w4_ref) + b4_ref[...], 0.0)
    y = dot(h, w5_ref) + b5_ref[...]                           # (TB, n_out) f32
    out_ref[...] = y.astype(out_ref.dtype)


# -----------------------------------------------------------------------------
# Tiling / VMEM helpers
# -----------------------------------------------------------------------------
def _round_up(x, m):
    return ((x + m - 1) // m) * m


def _choose_block_b(batch, requested):
    """Batch tile: up to 256 rows (fills the 256-wide v6e/v7x MXU; 128+ is
    already enough for v5e's 128-wide MXU), a multiple of 16 so bf16 vregs
    pack fully, preferring a size that minimizes the padded batch tail."""
    if requested is not None:
        return max(8, int(requested))
    hi = min(256, _round_up(batch, 16))
    lo = max(16, hi // 2)
    best, best_pad = hi, (-batch) % hi
    for cand in range(hi, lo - 1, -16):
        pad = (-batch) % cand
        if pad < best_pad:
            best, best_pad = cand, pad
            if pad == 0:
                break
    return best


def _vmem_estimate(block_b, n_in, n_hidden, n_out, weights, biases,
                   weight_buffers):
    """Working-set estimate (bytes) for the chosen tiling."""
    wbytes = sum(int(w.size) * w.dtype.itemsize for w in weights)
    # (1, n) bias blocks are padded to 8 sublanes in VMEM.
    bbytes = sum(8 * int(b.shape[-1]) * b.dtype.itemsize for b in biases)
    x_tiles = 2 * block_b * n_in * 4            # double-buffered f32 input tile
    o_tiles = 2 * block_b * n_out * 4           # double-buffered f32 output tile
    # live temporaries: f32 h, f32 matmul result, f32 relu/residual temp,
    # plus the bf16 cast of the dot operand
    act = block_b * n_hidden * (3 * 4 + 2) + block_b * max(n_in, n_out) * 2
    return weight_buffers * (wbytes + bbytes) + x_tiles + o_tiles + act


def _vmem_limit_bytes(est_bytes):
    """Generation-aware scoped-VMEM request (always set; v5e default is only
    16 MiB).  Cap leaves ~12.5% of physical per-core VMEM for compiler
    scratch: ~56 MiB on v7x (64 MiB/TC), ~112 MiB on v5e/v6e (128 MiB)."""
    try:
        cap = int(pltpu.get_tpu_info().vmem_capacity_bytes)
    except Exception:
        cap = 64 << 20                      # conservative: v7x per-core VMEM
    cap -= cap // 8
    want = max(int(est_bytes * 1.25) + (4 << 20), 32 << 20)
    return min(want, cap)


# -----------------------------------------------------------------------------
# Wrapper
# -----------------------------------------------------------------------------
def prepare_params(params):
    """One-time cast of the (in, out)-transposed weights to bf16 (the MXU
    operand dtype); biases stay f32 and are shaped (1, n) so they broadcast
    over the batch tile.  Do this once, not on every forward call."""
    w1, b1, w2, b2, w3, b3, w4, b4, w5, b5 = params
    cast = lambda w: w.astype(jnp.bfloat16)
    rb = lambda b: b.reshape(1, -1).astype(jnp.float32)
    return (cast(w1), rb(b1), cast(w2), rb(b2), cast(w3), rb(b3),
            cast(w4), rb(b4), cast(w5), rb(b5))


def linear_model(x, prepared_params, *, block_b=None):
    """x: (B, n_in) f32 -> (B, n_out) f32.  `prepared_params` from
    prepare_params(): bf16 (in, out) weights, f32 (1, out) biases."""
    B, n_in = x.shape
    w1, b1, w2, b2, w3, b3, w4, b4, w5, b5 = prepared_params
    n_hidden = w1.shape[1]
    n_out = w5.shape[1]
    weights = (w1, w2, w3, w4, w5)
    biases = (b1, b2, b3, b4, b5)

    tb = _choose_block_b(B, block_b)
    b_pad = _round_up(B, tb)
    xp = jnp.pad(x, ((0, b_pad - B), (0, 0))) if b_pad != B else x
    grid = (b_pad // tb,)

    flops = 2 * b_pad * (n_in * n_hidden + 3 * n_hidden * n_hidden
                         + n_hidden * n_out) + 9 * b_pad * n_hidden
    bytes_accessed = (b_pad * (n_in + n_out) * 4
                      + sum(int(a.size) * a.dtype.itemsize
                            for a in weights + biases))
    cost = pl.CostEstimate(flops=int(flops), transcendentals=0,
                           bytes_accessed=int(bytes_accessed))

    def const_spec(arr, single_buffer):
        nd = arr.ndim
        idx = lambda i, _nd=nd: (0,) * _nd
        if single_buffer:
            try:
                # Constant index_map => the second pipeline buffer is never
                # used; single-buffer it to halve weight VMEM (matters on
                # v7x's 64 MiB/core VMEM for n_hidden ~ 2048).
                return pl.BlockSpec(arr.shape, idx,
                                    pipeline_mode=pl.Buffered(1))
            except TypeError:
                pass
        return pl.BlockSpec(arr.shape, idx)

    def run(single_buffer_weights):
        weight_bufs = 1 if single_buffer_weights else 2
        est = _vmem_estimate(tb, n_in, n_hidden, n_out, weights, biases,
                             weight_bufs)
        call = pl.pallas_call(
            linear_model_kernel,
            out_shape=jax.ShapeDtypeStruct((b_pad, n_out), jnp.float32),
            grid=grid,
            in_specs=[
                pl.BlockSpec((tb, n_in), lambda i: (i, 0)),
                const_spec(w1, single_buffer_weights),
                const_spec(b1, single_buffer_weights),
                const_spec(w2, single_buffer_weights),
                const_spec(b2, single_buffer_weights),
                const_spec(w3, single_buffer_weights),
                const_spec(b3, single_buffer_weights),
                const_spec(w4, single_buffer_weights),
                const_spec(b4, single_buffer_weights),
                const_spec(w5, single_buffer_weights),
                const_spec(b5, single_buffer_weights),
            ],
            out_specs=pl.BlockSpec((tb, n_out), lambda i: (i, 0)),
            compiler_params=pltpu.CompilerParams(
                dimension_semantics=("parallel",),
                vmem_limit_bytes=_vmem_limit_bytes(est)),
            cost_estimate=cost,
        )
        return call(xp, w1, b1, w2, b2, w3, b3, w4, b4, w5, b5)

    # TODO(synk): for n_hidden >~ 2048 the weight-resident design approaches
    # v7x's 64 MiB per-core VMEM even single-buffered; add a second ("arbitrary")
    # grid axis tiling the output (N) dim of each square weight instead of
    # splitting into multiple pallas_calls that would re-stream weights.
    try:
        out = run(single_buffer_weights=True)
    except Exception:
        # Fallback for JAX versions where Buffered(1) on the auto-pipeline is
        # rejected at lowering time: keep default double-buffered weights.
        out = run(single_buffer_weights=False)
    return out[:B]


# -----------------------------------------------------------------------------
# Params / reference
# -----------------------------------------------------------------------------
def init_params(n_in, n_out, n_hidden):
    """PyTorch nn.Linear default init; weights stored transposed as (in, out)."""
    key = jax.random.PRNGKey(0)
    dims = [(n_in, n_hidden), (n_hidden, n_hidden), (n_hidden, n_hidden),
            (n_hidden, n_hidden), (n_hidden, n_out)]
    params = []
    for i, (fan_in, fan_out) in enumerate(dims):
        kw, kb = jax.random.split(jax.random.fold_in(key, i))
        bound = 1.0 / (fan_in ** 0.5)
        w = jax.random.uniform(kw, (fan_in, fan_out), jnp.float32, -bound, bound)
        b = jax.random.uniform(kb, (1, fan_out), jnp.float32, -bound, bound)
        params += [w, b]
    return tuple(params)


def ref_forward(x, params):
    """Pure-JAX reference mirroring the PyTorch forward with the kernel's
    mixed precision: bf16 dot operands, f32 accumulation/bias/ReLU/residual."""
    w1, b1, w2, b2, w3, b3, w4, b4, w5, b5 = params

    def dot(a, w):
        return jnp.dot(a.astype(jnp.bfloat16), w.astype(jnp.bfloat16),
                       preferred_element_type=jnp.float32)

    h = jnp.maximum(dot(x, w1) + b1, 0.0)
    h = h + jnp.maximum(dot(h, w2) + b2, 0.0)
    h = h + jnp.maximum(dot(h, w3) + b3, 0.0)
    h = h + jnp.maximum(dot(h, w4) + b4, 0.0)
    return dot(h, w5) + b5


if __name__ == "__main__":
    B, n_in, n_hidden, n_out = 16, 16, 128, 128
    key = jax.random.PRNGKey(0)
    x = jax.random.normal(key, (B, n_in), dtype=jnp.float32)

    params = init_params(n_in, n_out, n_hidden)
    prepared = prepare_params(params)          # one-time bf16 weight cast

    out = jax.block_until_ready(linear_model(x, prepared))

    ref = ref_forward(x, params)
    assert out.shape == (B, n_out), out.shape
    assert jnp.allclose(out, ref, atol=2e-3, rtol=2e-3), \
        float(jnp.max(jnp.abs(out - ref)))
    print("KERNEL_OK")
</pallas_src>

<mosaic_0001>
module attributes {stable_mosaic.version = 11 : i64} {
  func.func @linear_model_kernel(%arg0: i32, %arg1: memref<16x16xf32, #tpu.memory_space<vmem>>, %arg2: memref<16x128xbf16, #tpu.memory_space<vmem>>, %arg3: memref<1x128xf32, #tpu.memory_space<vmem>>, %arg4: memref<128x128xbf16, #tpu.memory_space<vmem>>, %arg5: memref<1x128xf32, #tpu.memory_space<vmem>>, %arg6: memref<128x128xbf16, #tpu.memory_space<vmem>>, %arg7: memref<1x128xf32, #tpu.memory_space<vmem>>, %arg8: memref<128x128xbf16, #tpu.memory_space<vmem>>, %arg9: memref<1x128xf32, #tpu.memory_space<vmem>>, %arg10: memref<128x128xbf16, #tpu.memory_space<vmem>>, %arg11: memref<1x128xf32, #tpu.memory_space<vmem>>, %arg12: memref<16x128xf32, #tpu.memory_space<vmem>>) attributes {dimension_semantics = [#tpu.dimension_semantics<parallel>], iteration_bounds = array<i64: 1>, scalar_prefetch = 0 : i64, scratch_operands = 0 : i64, tpu.core_type = #tpu.core_type<tc>, window_params = [{transform_indices = @transform_0, window_bounds = array<i64: 16, 16>}, {pipeline_mode = #tpu.pipeline_mode<synchronous>, transform_indices = @transform_1, window_bounds = array<i64: 16, 128>}, {pipeline_mode = #tpu.pipeline_mode<synchronous>, transform_indices = @transform_2, window_bounds = array<i64: 1, 128>}, {pipeline_mode = #tpu.pipeline_mode<synchronous>, transform_indices = @transform_3, window_bounds = array<i64: 128, 128>}, {pipeline_mode = #tpu.pipeline_mode<synchronous>, transform_indices = @transform_4, window_bounds = array<i64: 1, 128>}, {pipeline_mode = #tpu.pipeline_mode<synchronous>, transform_indices = @transform_5, window_bounds = array<i64: 128, 128>}, {pipeline_mode = #tpu.pipeline_mode<synchronous>, transform_indices = @transform_6, window_bounds = array<i64: 1, 128>}, {pipeline_mode = #tpu.pipeline_mode<synchronous>, transform_indices = @transform_7, window_bounds = array<i64: 128, 128>}, {pipeline_mode = #tpu.pipeline_mode<synchronous>, transform_indices = @transform_8, window_bounds = array<i64: 1, 128>}, {pipeline_mode = #tpu.pipeline_mode<synchronous>, transform_indices = @transform_9, window_bounds = array<i64: 128, 128>}, {pipeline_mode = #tpu.pipeline_mode<synchronous>, transform_indices = @transform_10, window_bounds = array<i64: 1, 128>}, {transform_indices = @transform_11, window_bounds = array<i64: 16, 128>}]} {
    %c0 = arith.constant 0 : index
    %c0_0 = arith.constant 0 : index
    %0 = vector.load %arg1[%c0, %c0_0] : memref<16x16xf32, #tpu.memory_space<vmem>>, vector<16x16xf32>
    %1 = arith.truncf %0 : vector<16x16xf32> to vector<16x16xbf16>
    %c0_1 = arith.constant 0 : index
    %c0_2 = arith.constant 0 : index
    %2 = vector.load %arg2[%c0_1, %c0_2] : memref<16x128xbf16, #tpu.memory_space<vmem>>, vector<16x128xbf16>
    %cst = arith.constant dense<0.000000e+00> : vector<16x128xf32>
    %3 = tpu.matmul %1, %2, %cst {dimension_numbers = #tpu.dot_dimension_numbers<[1], [0], [0], [1], [0, 0, 1, 1], [], []>} : vector<16x16xbf16>, vector<16x128xbf16>, vector<16x128xf32> -> vector<16x128xf32>
    %c0_3 = arith.constant 0 : index
    %c0_4 = arith.constant 0 : index
    %4 = vector.load %arg3[%c0_3, %c0_4] : memref<1x128xf32, #tpu.memory_space<vmem>>, vector<1x128xf32>
    %5 = vector.broadcast %4 : vector<1x128xf32> to vector<16x128xf32>
    %6 = arith.addf %3, %5 : vector<16x128xf32>
    %cst_5 = arith.constant 0.000000e+00 : f32
    %7 = vector.broadcast %cst_5 : f32 to vector<16x128xf32>
    %8 = arith.maximumf %6, %7 : vector<16x128xf32>
    %9 = arith.truncf %8 : vector<16x128xf32> to vector<16x128xbf16>
    %c0_6 = arith.constant 0 : index
    %c0_7 = arith.constant 0 : index
    %10 = vector.load %arg4[%c0_6, %c0_7] : memref<128x128xbf16, #tpu.memory_space<vmem>>, vector<128x128xbf16>
    %cst_8 = arith.constant dense<0.000000e+00> : vector<16x128xf32>
    %11 = tpu.matmul %9, %10, %cst_8 {dimension_numbers = #tpu.dot_dimension_numbers<[1], [0], [0], [1], [0, 0, 1, 1], [], []>} : vector<16x128xbf16>, vector<128x128xbf16>, vector<16x128xf32> -> vector<16x128xf32>
    %c0_9 = arith.constant 0 : index
    %c0_10 = arith.constant 0 : index
    %12 = vector.load %arg5[%c0_9, %c0_10] : memref<1x128xf32, #tpu.memory_space<vmem>>, vector<1x128xf32>
    %13 = vector.broadcast %12 : vector<1x128xf32> to vector<16x128xf32>
    %14 = arith.addf %11, %13 : vector<16x128xf32>
    %cst_11 = arith.constant 0.000000e+00 : f32
    %15 = vector.broadcast %cst_11 : f32 to vector<16x128xf32>
    %16 = arith.maximumf %14, %15 : vector<16x128xf32>
    %17 = arith.addf %8, %16 : vector<16x128xf32>
    %18 = arith.truncf %17 : vector<16x128xf32> to vector<16x128xbf16>
    %c0_12 = arith.constant 0 : index
    %c0_13 = arith.constant 0 : index
    %19 = vector.load %arg6[%c0_12, %c0_13] : memref<128x128xbf16, #tpu.memory_space<vmem>>, vector<128x128xbf16>
    %cst_14 = arith.constant dense<0.000000e+00> : vector<16x128xf32>
    %20 = tpu.matmul %18, %19, %cst_14 {dimension_numbers = #tpu.dot_dimension_numbers<[1], [0], [0], [1], [0, 0, 1, 1], [], []>} : vector<16x128xbf16>, vector<128x128xbf16>, vector<16x128xf32> -> vector<16x128xf32>
    %c0_15 = arith.constant 0 : index
    %c0_16 = arith.constant 0 : index
    %21 = vector.load %arg7[%c0_15, %c0_16] : memref<1x128xf32, #tpu.memory_space<vmem>>, vector<1x128xf32>
    %22 = vector.broadcast %21 : vector<1x128xf32> to vector<16x128xf32>
    %23 = arith.addf %20, %22 : vector<16x128xf32>
    %cst_17 = arith.constant 0.000000e+00 : f32
    %24 = vector.broadcast %cst_17 : f32 to vector<16x128xf32>
    %25 = arith.maximumf %23, %24 : vector<16x128xf32>
    %26 = arith.addf %17, %25 : vector<16x128xf32>
    %27 = arith.truncf %26 : vector<16x128xf32> to vector<16x128xbf16>
    %c0_18 = arith.constant 0 : index
    %c0_19 = arith.constant 0 : index
    %28 = vector.load %arg8[%c0_18, %c0_19] : memref<128x128xbf16, #tpu.memory_space<vmem>>, vector<128x128xbf16>
    %cst_20 = arith.constant dense<0.000000e+00> : vector<16x128xf32>
    %29 = tpu.matmul %27, %28, %cst_20 {dimension_numbers = #tpu.dot_dimension_numbers<[1], [0], [0], [1], [0, 0, 1, 1], [], []>} : vector<16x128xbf16>, vector<128x128xbf16>, vector<16x128xf32> -> vector<16x128xf32>
    %c0_21 = arith.constant 0 : index
    %c0_22 = arith.constant 0 : index
    %30 = vector.load %arg9[%c0_21, %c0_22] : memref<1x128xf32, #tpu.memory_space<vmem>>, vector<1x128xf32>
    %31 = vector.broadcast %30 : vector<1x128xf32> to vector<16x128xf32>
    %32 = arith.addf %29, %31 : vector<16x128xf32>
    %cst_23 = arith.constant 0.000000e+00 : f32
    %33 = vector.broadcast %cst_23 : f32 to vector<16x128xf32>
    %34 = arith.maximumf %32, %33 : vector<16x128xf32>
    %35 = arith.addf %26, %34 : vector<16x128xf32>
    %36 = arith.truncf %35 : vector<16x128xf32> to vector<16x128xbf16>
    %c0_24 = arith.constant 0 : index
    %c0_25 = arith.constant 0 : index
    %37 = vector.load %arg10[%c0_24, %c0_25] : memref<128x128xbf16, #tpu.memory_space<vmem>>, vector<128x128xbf16>
    %cst_26 = arith.constant dense<0.000000e+00> : vector<16x128xf32>
    %38 = tpu.matmul %36, %37, %cst_26 {dimension_numbers = #tpu.dot_dimension_numbers<[1], [0], [0], [1], [0, 0, 1, 1], [], []>} : vector<16x128xbf16>, vector<128x128xbf16>, vector<16x128xf32> -> vector<16x128xf32>
    %c0_27 = arith.constant 0 : index
    %c0_28 = arith.constant 0 : index
    %39 = vector.load %arg11[%c0_27, %c0_28] : memref<1x128xf32, #tpu.memory_space<vmem>>, vector<1x128xf32>
    %40 = vector.broadcast %39 : vector<1x128xf32> to vector<16x128xf32>
    %41 = arith.addf %38, %40 : vector<16x128xf32>
    %c0_29 = arith.constant 0 : index
    %c0_30 = arith.constant 0 : index
    %42 = vector.load %arg12[%c0_29, %c0_30] : memref<16x128xf32, #tpu.memory_space<vmem>>, vector<16x128xf32>
    tpu.vector_store %arg12[%c0_29, %c0_30], %41 {strides = array<i32>} : memref<16x128xf32, #tpu.memory_space<vmem>>, vector<16x128xf32>,
    return
  }
  func.func @transform_0(%arg0: i32) -> (i32, i32) {
    %c0_i32 = arith.constant 0 : i32
    %c0_i32_0 = arith.constant 0 : i32
    return %arg0, %c0_i32 : i32, i32
  }
  func.func @transform_1(%arg0: i32) -> (i32, i32) {
    %c0_i32 = arith.constant 0 : i32
    %c0_i32_0 = arith.constant 0 : i32
    %c0_i32_1 = arith.constant 0 : i32
    return %c0_i32, %c0_i32_0 : i32, i32
  }
  func.func @transform_2(%arg0: i32) -> (i32, i32) {
    %c0_i32 = arith.constant 0 : i32
    %c0_i32_0 = arith.constant 0 : i32
    %c0_i32_1 = arith.constant 0 : i32
    return %c0_i32, %c0_i32_0 : i32, i32
  }
  func.func @transform_3(%arg0: i32) -> (i32, i32) {
    %c0_i32 = arith.constant 0 : i32
    %c0_i32_0 = arith.constant 0 : i32
    %c0_i32_1 = arith.constant 0 : i32
    return %c0_i32, %c0_i32_0 : i32, i32
  }
  func.func @transform_4(%arg0: i32) -> (i32, i32) {
    %c0_i32 = arith.constant 0 : i32
    %c0_i32_0 = arith.constant 0 : i32
    %c0_i32_1 = arith.constant 0 : i32
    return %c0_i32, %c0_i32_0 : i32, i32
  }
  func.func @transform_5(%arg0: i32) -> (i32, i32) {
    %c0_i32 = arith.constant 0 : i32
    %c0_i32_0 = arith.constant 0 : i32
    %c0_i32_1 = arith.constant 0 : i32
    return %c0_i32, %c0_i32_0 : i32, i32
  }
  func.func @transform_6(%arg0: i32) -> (i32, i32) {
    %c0_i32 = arith.constant 0 : i32
    %c0_i32_0 = arith.constant 0 : i32
    %c0_i32_1 = arith.constant 0 : i32
    return %c0_i32, %c0_i32_0 : i32, i32
  }
  func.func @transform_7(%arg0: i32) -> (i32, i32) {
    %c0_i32 = arith.constant 0 : i32
    %c0_i32_0 = arith.constant 0 : i32
    %c0_i32_1 = arith.constant 0 : i32
    return %c0_i32, %c0_i32_0 : i32, i32
  }
  func.func @transform_8(%arg0: i32) -> (i32, i32) {
    %c0_i32 = arith.constant 0 : i32
    %c0_i32_0 = arith.constant 0 : i32
    %c0_i32_1 = arith.constant 0 : i32
    return %c0_i32, %c0_i32_0 : i32, i32
  }
  func.func @transform_9(%arg0: i32) -> (i32, i32) {
    %c0_i32 = arith.constant 0 : i32
    %c0_i32_0 = arith.constant 0 : i32
    %c0_i32_1 = arith.constant 0 : i32
    return %c0_i32, %c0_i32_0 : i32, i32
  }
  func.func @transform_10(%arg0: i32) -> (i32, i32) {
    %c0_i32 = arith.constant 0 : i32
    %c0_i32_0 = arith.constant 0 : i32
    %c0_i32_1 = arith.constant 0 : i32
    return %c0_i32, %c0_i32_0 : i32, i32
  }
  func.func @transform_11(%arg0: i32) -> (i32, i32) {
    %c0_i32 = arith.constant 0 : i32
    %c0_i32_0 = arith.constant 0 : i32
    return %arg0, %c0_i32 : i32, i32
  }
}

module attributes {stable_mosaic.version = 11 : i64} {
  func.func @linear_model_kernel(%arg0: i32, %arg1: memref<16x16xf32, #tpu.memory_space<vmem>>, %arg2: memref<16x128xbf16, #tpu.memory_space<vmem>>, %arg3: memref<1x128xf32, #tpu.memory_space<vmem>>, %arg4: memref<128x128xbf16, #tpu.memory_space<vmem>>, %arg5: memref<1x128xf32, #tpu.memory_space<vmem>>, %arg6: memref<128x128xbf16, #tpu.memory_space<vmem>>, %arg7: memref<1x128xf32, #tpu.memory_space<vmem>>, %arg8: memref<128x128xbf16, #tpu.memory_space<vmem>>, %arg9: memref<1x128xf32, #tpu.memory_space<vmem>>, %arg10: memref<128x128xbf16, #tpu.memory_space<vmem>>, %arg11: memref<1x128xf32, #tpu.memory_space<vmem>>, %arg12: memref<16x128xf32, #tpu.memory_space<vmem>>) attributes {dimension_semantics = [#tpu.dimension_semantics<parallel>], iteration_bounds = array<i64: 1>, scalar_prefetch = 0 : i64, scratch_operands = 0 : i64, tpu.core_type = #tpu.core_type<tc>, window_params = [{transform_indices = @transform_0, window_bounds = array<i64: 16, 16>}, {pipeline_mode = #tpu.pipeline_mode<synchronous>, transform_indices = @transform_1, window_bounds = array<i64: 16, 128>}, {pipeline_mode = #tpu.pipeline_mode<synchronous>, transform_indices = @transform_2, window_bounds = array<i64: 1, 128>}, {pipeline_mode = #tpu.pipeline_mode<synchronous>, transform_indices = @transform_3, window_bounds = array<i64: 128, 128>}, {pipeline_mode = #tpu.pipeline_mode<synchronous>, transform_indices = @transform_4, window_bounds = array<i64: 1, 128>}, {pipeline_mode = #tpu.pipeline_mode<synchronous>, transform_indices = @transform_5, window_bounds = array<i64: 128, 128>}, {pipeline_mode = #tpu.pipeline_mode<synchronous>, transform_indices = @transform_6, window_bounds = array<i64: 1, 128>}, {pipeline_mode = #tpu.pipeline_mode<synchronous>, transform_indices = @transform_7, window_bounds = array<i64: 128, 128>}, {pipeline_mode = #tpu.pipeline_mode<synchronous>, transform_indices = @transform_8, window_bounds = array<i64: 1, 128>}, {pipeline_mode = #tpu.pipeline_mode<synchronous>, transform_indices = @transform_9, window_bounds = array<i64: 128, 128>}, {pipeline_mode = #tpu.pipeline_mode<synchronous>, transform_indices = @transform_10, window_bounds = array<i64: 1, 128>}, {transform_indices = @transform_11, window_bounds = array<i64: 16, 128>}]} {
    %c0 = arith.constant 0 : index
    %c0_0 = arith.constant 0 : index
    %0 = vector.load %arg1[%c0, %c0_0] : memref<16x16xf32, #tpu.memory_space<vmem>>, vector<16x16xf32>
    %1 = arith.truncf %0 : vector<16x16xf32> to vector<16x16xbf16>
    %c0_1 = arith.constant 0 : index
    %c0_2 = arith.constant 0 : index
    %2 = vector.load %arg2[%c0_1, %c0_2] : memref<16x128xbf16, #tpu.memory_space<vmem>>, vector<16x128xbf16>
    %cst = arith.constant dense<0.000000e+00> : vector<16x128xf32>
    %3 = tpu.matmul %1, %2, %cst {dimension_numbers = #tpu.dot_dimension_numbers<[1], [0], [0], [1], [0, 0, 1, 1], [], []>} : vector<16x16xbf16>, vector<16x128xbf16>, vector<16x128xf32> -> vector<16x128xf32>
    %c0_3 = arith.constant 0 : index
    %c0_4 = arith.constant 0 : index
    %4 = vector.load %arg3[%c0_3, %c0_4] : memref<1x128xf32, #tpu.memory_space<vmem>>, vector<1x128xf32>
    %5 = vector.broadcast %4 : vector<1x128xf32> to vector<16x128xf32>
    %6 = arith.addf %3, %5 : vector<16x128xf32>
    %cst_5 = arith.constant 0.000000e+00 : f32
    %7 = vector.broadcast %cst_5 : f32 to vector<16x128xf32>
    %8 = arith.maximumf %6, %7 : vector<16x128xf32>
    %9 = arith.truncf %8 : vector<16x128xf32> to vector<16x128xbf16>
    %c0_6 = arith.constant 0 : index
    %c0_7 = arith.constant 0 : index
    %10 = vector.load %arg4[%c0_6, %c0_7] : memref<128x128xbf16, #tpu.memory_space<vmem>>, vector<128x128xbf16>
    %cst_8 = arith.constant dense<0.000000e+00> : vector<16x128xf32>
    %11 = tpu.matmul %9, %10, %cst_8 {dimension_numbers = #tpu.dot_dimension_numbers<[1], [0], [0], [1], [0, 0, 1, 1], [], []>} : vector<16x128xbf16>, vector<128x128xbf16>, vector<16x128xf32> -> vector<16x128xf32>
    %c0_9 = arith.constant 0 : index
    %c0_10 = arith.constant 0 : index
    %12 = vector.load %arg5[%c0_9, %c0_10] : memref<1x128xf32, #tpu.memory_space<vmem>>, vector<1x128xf32>
    %13 = vector.broadcast %12 : vector<1x128xf32> to vector<16x128xf32>
    %14 = arith.addf %11, %13 : vector<16x128xf32>
    %cst_11 = arith.constant 0.000000e+00 : f32
    %15 = vector.broadcast %cst_11 : f32 to vector<16x128xf32>
    %16 = arith.maximumf %14, %15 : vector<16x128xf32>
    %17 = arith.addf %8, %16 : vector<16x128xf32>
    %18 = arith.truncf %17 : vector<16x128xf32> to vector<16x128xbf16>
    %c0_12 = arith.constant 0 : index
    %c0_13 = arith.constant 0 : index
    %19 = vector.load %arg6[%c0_12, %c0_13] : memref<128x128xbf16, #tpu.memory_space<vmem>>, vector<128x128xbf16>
    %cst_14 = arith.constant dense<0.000000e+00> : vector<16x128xf32>
    %20 = tpu.matmul %18, %19, %cst_14 {dimension_numbers = #tpu.dot_dimension_numbers<[1], [0], [0], [1], [0, 0, 1, 1], [], []>} : vector<16x128xbf16>, vector<128x128xbf16>, vector<16x128xf32> -> vector<16x128xf32>
    %c0_15 = arith.constant 0 : index
    %c0_16 = arith.constant 0 : index
    %21 = vector.load %arg7[%c0_15, %c0_16] : memref<1x128xf32, #tpu.memory_space<vmem>>, vector<1x128xf32>
    %22 = vector.broadcast %21 : vector<1x128xf32> to vector<16x128xf32>
    %23 = arith.addf %20, %22 : vector<16x128xf32>
    %cst_17 = arith.constant 0.000000e+00 : f32
    %24 = vector.broadcast %cst_17 : f32 to vector<16x128xf32>
    %25 = arith.maximumf %23, %24 : vector<16x128xf32>
    %26 = arith.addf %17, %25 : vector<16x128xf32>
    %27 = arith.truncf %26 : vector<16x128xf32> to vector<16x128xbf16>
    %c0_18 = arith.constant 0 : index
    %c0_19 = arith.constant 0 : index
    %28 = vector.load %arg8[%c0_18, %c0_19] : memref<128x128xbf16, #tpu.memory_space<vmem>>, vector<128x128xbf16>
    %cst_20 = arith.constant dense<0.000000e+00> : vector<16x128xf32>
    %29 = tpu.matmul %27, %28, %cst_20 {dimension_numbers = #tpu.dot_dimension_numbers<[1], [0], [0], [1], [0, 0, 1, 1], [], []>} : vector<16x128xbf16>, vector<128x128xbf16>, vector<16x128xf32> -> vector<16x128xf32>
    %c0_21 = arith.constant 0 : index
    %c0_22 = arith.constant 0 : index
    %30 = vector.load %arg9[%c0_21, %c0_22] : memref<1x128xf32, #tpu.memory_space<vmem>>, vector<1x128xf32>
    %31 = vector.broadcast %30 : vector<1x128xf32> to vector<16x128xf32>
    %32 = arith.addf %29, %31 : vector<16x128xf32>
    %cst_23 = arith.constant 0.000000e+00 : f32
    %33 = vector.broadcast %cst_23 : f32 to vector<16x128xf32>
    %34 = arith.maximumf %32, %33 : vector<16x128xf32>
    %35 = arith.addf %26, %34 : vector<16x128xf32>
    %36 = arith.truncf %35 : vector<16x128xf32> to vector<16x128xbf16>
    %c0_24 = arith.constant 0 : index
    %c0_25 = arith.constant 0 : index
    %37 = vector.load %arg10[%c0_24, %c0_25] : memref<128x128xbf16, #tpu.memory_space<vmem>>, vector<128x128xbf16>
    %cst_26 = arith.constant dense<0.000000e+00> : vector<16x128xf32>
    %38 = tpu.matmul %36, %37, %cst_26 {dimension_numbers = #tpu.dot_dimension_numbers<[1], [0], [0], [1], [0, 0, 1, 1], [], []>} : vector<16x128xbf16>, vector<128x128xbf16>, vector<16x128xf32> -> vector<16x128xf32>
    %c0_27 = arith.constant 0 : index
    %c0_28 = arith.constant 0 : index
    %39 = vector.load %arg11[%c0_27, %c0_28] : memref<1x128xf32, #tpu.memory_space<vmem>>, vector<1x128xf32>
    %40 = vector.broadcast %39 : vector<1x128xf32> to vector<16x128xf32>
    %41 = arith.addf %38, %40 : vector<16x128xf32>
    %c0_29 = arith.constant 0 : index
    %c0_30 = arith.constant 0 : index
    %42 = vector.load %arg12[%c0_29, %c0_30] : memref<16x128xf32, #tpu.memory_space<vmem>>, vector<16x128xf32>
    tpu.vector_store %arg12[%c0_29, %c0_30], %41 {strides = array<i32>} : memref<16x128xf32, #tpu.memory_space<vmem>>, vector<16x128xf32>,
    return
  }
  func.func @transform_0(%arg0: i32) -> (i32, i32) {
    %c0_i32 = arith.constant 0 : i32
    %c0_i32_0 = arith.constant 0 : i32
    return %arg0, %c0_i32 : i32, i32
  }
  func.func @transform_1(%arg0: i32) -> (i32, i32) {
    %c0_i32 = arith.constant 0 : i32
    %c0_i32_0 = arith.constant 0 : i32
    %c0_i32_1 = arith.constant 0 : i32
    return %c0_i32, %c0_i32_0 : i32, i32
  }
  func.func @transform_2(%arg0: i32) -> (i32, i32) {
    %c0_i32 = arith.constant 0 : i32
    %c0_i32_0 = arith.constant 0 : i32
    %c0_i32_1 = arith.constant 0 : i32
    return %c0_i32, %c0_i32_0 : i32, i32
  }
  func.func @transform_3(%arg0: i32) -> (i32, i32) {
    %c0_i32 = arith.constant 0 : i32
    %c0_i32_0 = arith.constant 0 : i32
    %c0_i32_1 = arith.constant 0 : i32
    return %c0_i32, %c0_i32_0 : i32, i32
  }
  func.func @transform_4(%arg0: i32) -> (i32, i32) {
    %c0_i32 = arith.constant 0 : i32
    %c0_i32_0 = arith.constant 0 : i32
    %c0_i32_1 = arith.constant 0 : i32
    return %c0_i32, %c0_i32_0 : i32, i32
  }
  func.func @transform_5(%arg0: i32) -> (i32, i32) {
    %c0_i32 = arith.constant 0 : i32
    %c0_i32_0 = arith.constant 0 : i32
    %c0_i32_1 = arith.constant 0 : i32
    return %c0_i32, %c0_i32_0 : i32, i32
  }
  func.func @transform_6(%arg0: i32) -> (i32, i32) {
    %c0_i32 = arith.constant 0 : i32
    %c0_i32_0 = arith.constant 0 : i32
    %c0_i32_1 = arith.constant 0 : i32
    return %c0_i32, %c0_i32_0 : i32, i32
  }
  func.func @transform_7(%arg0: i32) -> (i32, i32) {
    %c0_i32 = arith.constant 0 : i32
    %c0_i32_0 = arith.constant 0 : i32
    %c0_i32_1 = arith.constant 0 : i32
    return %c0_i32, %c0_i32_0 : i32, i32
  }
  func.func @transform_8(%arg0: i32) -> (i32, i32) {
    %c0_i32 = arith.constant 0 : i32
    %c0_i32_0 = arith.constant 0 : i32
    %c0_i32_1 = arith.constant 0 : i32
    return %c0_i32, %c0_i32_0 : i32, i32
  }
  func.func @transform_9(%arg0: i32) -> (i32, i32) {
    %c0_i32 = arith.constant 0 : i32
    %c0_i32_0 = arith.constant 0 : i32
    %c0_i32_1 = arith.constant 0 : i32
    return %c0_i32, %c0_i32_0 : i32, i32
  }
  func.func @transform_10(%arg0: i32) -> (i32, i32) {
    %c0_i32 = arith.constant 0 : i32
    %c0_i32_0 = arith.constant 0 : i32
    %c0_i32_1 = arith.constant 0 : i32
    return %c0_i32, %c0_i32_0 : i32, i32
  }
  func.func @transform_11(%arg0: i32) -> (i32, i32) {
    %c0_i32 = arith.constant 0 : i32
    %c0_i32_0 = arith.constant 0 : i32
    return %arg0, %c0_i32 : i32, i32
  }
}

</mosaic_0001>

<bundles_post_ra>
// kernel: tpu_custom_call.1
= control target key start
LH: loop header
LB: loop body
LE: loop exit
PB: predicated region body
PF: predicated region fallthrough
CT: control target
= control target key end

     0   :  { %16 = vsyncpa [#allocation3], 0  ;;  %s1025_s0 = inlined_call_operand.hbm [shape: f32[16,16], index: 0, kind: input, shape index: {}]   ;;  %s1026_s1 = inlined_call_operand.hbm [shape: bf16[16,128], index: 1, kind: input, shape index: {}]   ;;  %s1027_s2 = inlined_call_operand.vmem [shape: f32[1,128], index: 2, kind: input, shape index: {}]   ;;  %s1028_s3 = inlined_call_operand.hbm [shape: bf16[128,128], index: 3, kind: input, shape index: {}]   ;;  %s1029_s4 = inlined_call_operand.vmem [shape: f32[1,128], index: 4, kind: input, shape index: {}]   ;;  %s1030_s5 = inlined_call_operand.hbm [shape: bf16[128,128], index: 5, kind: input, shape index: {}]   ;;  %s1031_s6 = inlined_call_operand.vmem [shape: f32[1,128], index: 6, kind: input, shape index: {}]   ;;  %s1032_s7 = inlined_call_operand.hbm [shape: bf16[128,128], index: 7, kind: input, shape index: {}]   ;;  %s1033_s8 = inlined_call_operand.vmem [shape: f32[1,128], index: 8, kind: input, shape index: {}]   ;;  %s1034_s9 = inlined_call_operand.hbm [shape: bf16[128,128], index: 9, kind: input, shape index: {}]   ;;  %s1035_s10 = inlined_call_operand.vmem [shape: f32[1,128], index: 10, kind: input, shape index: {}]   ;;  %s1036_s11 = inlined_call_operand.hbm [shape: f32[16,128], index: 11, kind: output, shape index: {}]  }
   0x1   :  { %17 = vsyncpa [#allocation6], 0 }
   0x2   :  { %18 = vsyncpa [#allocation9], 0 }
   0x3   :  { %19 = vsyncpa [#allocation12], 0  ;;  %s38_s19 = sshll.u32 %s1026_s1, 4  ;;  %s39_s19 = int_to_ptr.hbm [resolvable:$true] %s38_s19 }
   0x4   :  { %20 = vsyncpa [#allocation4], 0  ;;  %s897_s20 = smov [#allocation5]   ;;  %s68_s24 = sshll.u32 %s1030_s5, 4  ;;  %s69_s24 = int_to_ptr.hbm [resolvable:$true] %s68_s24 }
   0x5   :  { %s40_s21 = sshll.u32 %s897_s20, 4  ;;  %s898_s25 = smov 64   ;;  %s41_s21 = int_to_ptr.vmem [resolvable:$true] %s40_s21 }
   0x6   :  { %s899_s26 = smov 4   ;;  %s900_s27 = smov [#allocation8]  }
   0x7   :  { %46 = dma.hbm_to_vmem [thread:$0]  %s39_s19, 128, %s41_s21, [#allocation6], %s898_s25, %s898_s25, %s899_s26  }
   0x8   :  { %s70_s28 = sshll.u32 %s900_s27, 4  ;;  %s25_s30 = sshll.u32 %s1025_s0, 4  ;;  %s71_s28 = int_to_ptr.vmem [resolvable:$true] %s70_s28  ;;  %s26_s30 = int_to_ptr.hbm [resolvable:$true] %s25_s30 }
   0x9   :  { %76 = dma.hbm_to_vmem [thread:$0]  %s69_s24, 1024, %s71_s28, [#allocation9], %s898_s25, %s898_s25, %s899_s26  }
   0xa   :  { %s901_s5 = smov [#allocation2]   ;;  %s53_s15 = sshll.u32 %s1028_s3, 4  ;;  %s54_s15 = int_to_ptr.hbm [resolvable:$true] %s53_s15 }
   0xb   :  { %s27_s12 = sshll.u32 %s901_s5, 4  ;;  %s902_s16 = smov 128   ;;  %s28_s12 = int_to_ptr.vmem [resolvable:$true] %s27_s12 }
   0xc   :  { %s903_s17 = smov 8   ;;  %s904_s0 = smov [#allocation7]  }
   0xd   :  { %33 = dma.hbm_to_vmem [thread:$0]  %s26_s30, 256, %s28_s12, [#allocation3], %s902_s16, %s902_s16, %s903_s17  }
   0xe   :  { %s55_s18 = sshll.u32 %s904_s0, 4  ;;  %s83_s21 = sshll.u32 %s1032_s7, 4  ;;  %s56_s18 = int_to_ptr.vmem [resolvable:$true] %s55_s18  ;;  %s84_s21 = int_to_ptr.hbm [resolvable:$true] %s83_s21 }
   0xf   :  { %61 = dma.hbm_to_vmem [thread:$0]  %s54_s15, 1024, %s56_s18, [#allocation6], %s898_s25, %s898_s25, %s899_s26  }
  0x10   :  { %s98_s23 = sshll.u32 %s1034_s9, 4  ;;  %s905_s24 = smov [#allocation10]   ;;  %s99_s23 = int_to_ptr.hbm [resolvable:$true] %s98_s23 }
  0x11   :  { %s85_s27 = sshll.u32 %s905_s24, 4  ;;  %s906_s28 = smov [#allocation11]   ;;  %s86_s27 = int_to_ptr.vmem [resolvable:$true] %s85_s27 }
  0x12   :  { %91 = dma.hbm_to_vmem [thread:$0]  %s84_s21, 1024, %s86_s27, [#allocation9], %s898_s25, %s898_s25, %s899_s26  }
  0x13   :  { %s100_s7 = sshll.u32 %s906_s28, 4  ;;  %s101_s7 = int_to_ptr.vmem [resolvable:$true] %s100_s7 }
  0x14   :  { %106 = dma.hbm_to_vmem [thread:$0]  %s99_s23, 1024, %s101_s7, [#allocation12], %s898_s25, %s898_s25, %s899_s26  }
  0x15   :  { %887 = dma.done.wait [#allocation3], 256  }
  0x16   :  { %888 = vsyncadd [#allocation3], 4294967040 }
  0x17   :  { %889 = dma.done.wait [#allocation6], 1152  }
  0x18   :  { %890 = vsyncadd [#allocation6], 4294966144 }
  0x19   :  { %891 = dma.done.wait [#allocation9], 2048  }
  0x1a   :  { %892 = vsyncadd [#allocation9], 4294965248 }
  0x1b   :  { %893 = dma.done.wait [#allocation12], 1024  }
  0x1c   :  { %894 = vsyncadd [#allocation12], 4294966272  ;;  %v670_v0 = vld [vmem:[#allocation5] sm:$0xff]  ;;  %v134_v1 = vld [vmem:[#allocation2] sm:$0xff]  ;;  %vm149_vm0 = vcmask 130048   ;;  %s907_s12 = smov [#allocation13]  }
  0x1d   :  { %v135_v2 = vld [vmem:[#allocation2 + $0x8] sm:$0xff]  ;;  %v678_v4 = vld [vmem:[#allocation7 + $0x38] sm:$0xff]  ;;  %160 = vmatpush.bf16.msra.mxu0 %v670_v0  ;;  %v676_v6 = vld [vmem:[#allocation7 + $0x28] sm:$0xff]  ;;  %s519_s13 = sshll.u32 %s907_s12, 4  ;;  %s521_s15 = sshll.u32 %s1036_s11, 4  ;;  %s520_s13 = int_to_ptr.vmem [resolvable:$true] %s519_s13  ;;  %s522_s15 = int_to_ptr.hbm [resolvable:$true] %s521_s15 }
  0x1e   :  { %v136_v3 = vpack.c.bf16 %v135_v2, %v134_v1  ;;  %v677_v5 = vld [vmem:[#allocation7 + $0x30] sm:$0xff]  ;;  %238 = vmatpush.bf16.msra.mxu1 %v678_v4  ;;  %v675_v7 = vld [vmem:[#allocation7 + $0x20] sm:$0xff]  ;;  %v674_v8 = vld [vmem:[#allocation7 + $0x18] sm:$0xff] }
  0x1f   :  { %v673_v9 = vld [vmem:[#allocation7 + $0x10] sm:$0xff]  ;;  %v672_v10 = vld [vmem:[#allocation7 + $0x8] sm:$0xff]  ;;  %v671_v11 = vld [vmem:[#allocation7] sm:$0xff] }
  0x20   :  { %541 = vmatmul.msk.bf16.vlgmr.msra.gmra.mxu0 %vm149_vm0, %v136_v3  ;;  %v686_v12 = vld [vmem:[#allocation8 + $0x38] sm:$0xff]  ;;  %v685_v13 = vld [vmem:[#allocation8 + $0x30] sm:$0xff]  ;;  %v684_v14 = vld [vmem:[#allocation8 + $0x28] sm:$0xff] }
  0x21   :  { %325 = vmatpush.bf16.msra.mxu2 %v686_v12  ;;  %v683_v15 = vld [vmem:[#allocation8 + $0x20] sm:$0xff]  ;;  %v714_v17 = vld [vmem:[%s1027_s2] ss:$0 sm:$0xff]  ;;  %v682_v24 = vld [vmem:[#allocation8 + $0x18] sm:$0xff] }
  0x22   :  { %239 = vmatpush.bf16.msra.mxu1 %v677_v5  ;;  %v681_v25 = vld [vmem:[#allocation8 + $0x10] sm:$0xff]  ;;  %v680_v26 = vld [vmem:[#allocation8 + $0x8] sm:$0xff]  ;;  %v679_v27 = vld [vmem:[#allocation8] sm:$0xff] }
  0x23   :  { %v694_v28 = vld [vmem:[#allocation10 + $0x38] sm:$0xff]  ;;  %v693_v29 = vld [vmem:[#allocation10 + $0x30] sm:$0xff]  ;;  %v692_v30 = vld [vmem:[#allocation10 + $0x28] sm:$0xff] }
  0x24   :  { %412 = vmatpush.bf16.msra.mxu3 %v694_v28  ;;  %v691_v31 = vld [vmem:[#allocation10 + $0x20] sm:$0xff]  ;;  %v715_v33 = vld [vmem:[%s1029_s4] ss:$0 sm:$0xff]  ;;  %v690_v42 = vld [vmem:[#allocation10 + $0x18] sm:$0xff] }
  0x25   :  { %326 = vmatpush.bf16.msra.mxu2 %v685_v13  ;;  %v689_v43 = vld [vmem:[#allocation10 + $0x10] sm:$0xff]  ;;  %v688_v44 = vld [vmem:[#allocation10 + $0x8] sm:$0xff]  ;;  %v687_v45 = vld [vmem:[#allocation10] sm:$0xff] }
  0x26   :  { %240 = vmatpush.bf16.msra.mxu1 %v676_v6  ;;  %v702_v46 = vld [vmem:[#allocation11 + $0x38] sm:$0xff]  ;;  %v701_v47 = vld [vmem:[#allocation11 + $0x30] sm:$0xff]  ;;  %v700_v48 = vld [vmem:[#allocation11 + $0x28] sm:$0xff] }
  0x27   :  { %499 = vmatpush.bf16.msrb.mxu0 %v702_v46  ;;  %v699_v49 = vld [vmem:[#allocation11 + $0x20] sm:$0xff]  ;;  %v716_v51 = vld [vmem:[%s1031_s6] ss:$0 sm:$0xff]  ;;  %v698_v60 = vld [vmem:[#allocation11 + $0x18] sm:$0xff] }
  0x28   :  { %413 = vmatpush.bf16.msra.mxu3 %v693_v29  ;;  %v697_v61 = vld [vmem:[#allocation11 + $0x10] sm:$0xff]  ;;  %v696_v62 = vld [vmem:[#allocation11 + $0x8] sm:$0xff]  ;;  %v695_v63 = vld [vmem:[#allocation11] sm:$0xff] }
  0x29   :  { %327 = vmatpush.bf16.msra.mxu2 %v684_v14  ;;  %v717_v1 = vld [vmem:[%s1033_s8] ss:$0 sm:$0xff] }
  0x2a   :  { %241 = vmatpush.bf16.msra.mxu1 %v675_v7 }
  0x2b   :  { %500 = vmatpush.bf16.msrb.mxu0 %v701_v47 }
  0x2c   :  { %414 = vmatpush.bf16.msra.mxu3 %v692_v30 }
  0x2d   :  { %328 = vmatpush.bf16.msra.mxu2 %v683_v15 }
  0x2e   :  { %242 = vmatpush.bf16.msra.mxu1 %v674_v8 }
  0x2f   :  { %501 = vmatpush.bf16.msrb.mxu0 %v700_v48 }
  0x30   :  { %415 = vmatpush.bf16.msra.mxu3 %v691_v31 }
  0x31   :  { %329 = vmatpush.bf16.msra.mxu2 %v682_v24 }
  0x32   :  { %243 = vmatpush.bf16.msra.mxu1 %v673_v9 }
  0x33   :  { %502 = vmatpush.bf16.msrb.mxu0 %v699_v49 }
  0x34   :  { %416 = vmatpush.bf16.msra.mxu3 %v690_v42 }
  0x35   :  { %330 = vmatpush.bf16.msra.mxu2 %v681_v25 }
  0x36   :  { %244 = vmatpush.bf16.msra.mxu1 %v672_v10  ;;  %v718_v10 = vld [vmem:[%s1035_s10] ss:$0 sm:$0xff] }
  0x37   :  { %503 = vmatpush.bf16.msrb.mxu0 %v698_v60 }
  0x38   :  { %417 = vmatpush.bf16.msra.mxu3 %v689_v43 }
  0x39   :  { %331 = vmatpush.bf16.msra.mxu2 %v680_v26 }
  0x3a   :  { %245 = vmatpush.bf16.msra.mxu1 %v671_v11 }
  0x3b   :  { %504 = vmatpush.bf16.msrb.mxu0 %v697_v61 }
  0x3c   :  { %418 = vmatpush.bf16.msra.mxu3 %v688_v44 }
  0x3d   :  { %332 = vmatpush.bf16.msra.mxu2 %v679_v27 }
  0x3f   :  { %505 = vmatpush.bf16.msrb.mxu0 %v696_v62 }
  0x40   :  { %419 = vmatpush.bf16.msra.mxu3 %v687_v45 }
  0x43   :  { %506 = vmatpush.bf16.msrb.mxu0 %v695_v63 }
  0x9d   :  { %v162_v16 = vpop.f32.mrf.mxu0 }
  0x9e   :  { %v163_v18 = vadd.f32 %v714_v17, %v162_v16 }
  0xa0   :  { %v167_v21 = vmax.f32 %v163_v18, 0.0 }
  0xa5   :  { %v164_v19 = vpop.f32.mrf.mxu0 }
  0xa6   :  { %v165_v20 = vadd.f32 %v714_v17, %v164_v19 }
  0xa8   :  { %v168_v22 = vmax.f32 %v165_v20, 0.0 }
  0xaa   :  { %v169_v23 = vpack.c.bf16 %v168_v22, %v167_v21 }
  0xac   :  { %246 = vmatmul.bf16.vlgmr.msra.gmra.mxu1 %v169_v23 }
 0x129   :  { %v247_v32 = vpop.f32.mrf.mxu1 }
 0x12a   :  { %v248_v34 = vadd.f32 %v715_v33, %v247_v32 }
 0x12c   :  { %v252_v36 = vmax.f32 %v248_v34, 0.0 }
 0x12e   :  { %v254_v39 = vadd.f32 %v252_v36, %v167_v21 }
 0x131   :  { %v249_v35 = vpop.f32.mrf.mxu1 }
 0x132   :  { %v250_v37 = vadd.f32 %v715_v33, %v249_v35 }
 0x134   :  { %v253_v38 = vmax.f32 %v250_v37, 0.0 }
 0x136   :  { %v255_v40 = vadd.f32 %v253_v38, %v168_v22 }
 0x138   :  { %v256_v41 = vpack.c.bf16 %v255_v40, %v254_v39 }
 0x13a   :  { %333 = vmatmul.bf16.vlgmr.msra.gmra.mxu2 %v256_v41 }
 0x1bd   :  { %v334_v50 = vpop.f32.mrf.mxu2 }
 0x1be   :  { %v335_v52 = vadd.f32 %v716_v51, %v334_v50 }
 0x1c0   :  { %v339_v54 = vmax.f32 %v335_v52, 0.0 }
 0x1c2   :  { %v341_v57 = vadd.f32 %v339_v54, %v254_v39 }
 0x1c5   :  { %v336_v53 = vpop.f32.mrf.mxu2 }
 0x1c6   :  { %v337_v55 = vadd.f32 %v716_v51, %v336_v53 }
 0x1c8   :  { %v340_v56 = vmax.f32 %v337_v55, 0.0 }
 0x1ca   :  { %v342_v58 = vadd.f32 %v340_v56, %v255_v40 }
 0x1cc   :  { %v343_v59 = vpack.c.bf16 %v342_v58, %v341_v57 }
 0x1ce   :  { %420 = vmatmul.bf16.vlgmr.msra.gmra.mxu3 %v343_v59 }
 0x251   :  { %v421_v0 = vpop.f32.mrf.mxu3 }
 0x252   :  { %v422_v2 = vadd.f32 %v717_v1, %v421_v0 }
 0x254   :  { %v426_v4 = vmax.f32 %v422_v2, 0.0 }
 0x256   :  { %v428_v7 = vadd.f32 %v426_v4, %v341_v57 }
 0x259   :  { %v423_v3 = vpop.f32.mrf.mxu3 }
 0x25a   :  { %v424_v5 = vadd.f32 %v717_v1, %v423_v3 }
 0x25c   :  { %v427_v6 = vmax.f32 %v424_v5, 0.0 }
 0x25e   :  { %v429_v8 = vadd.f32 %v427_v6, %v342_v58 }
 0x260   :  { %v430_v9 = vpack.c.bf16 %v429_v8, %v428_v7 }
 0x262   :  { %507 = vmatmul.bf16.vlgmr.msrb.gmra.mxu0 %v430_v9 }
 0x2df   :  { %v508_v11 = vpop.f32.mrf.mxu0 }
 0x2e0   :  { %v509_v12 = vadd.f32 %v718_v10, %v508_v11 }
 0x2e2   :  { %513 = vst [vmem:[#allocation13] sm:$0xff] %v509_v12 }
 0x2e7   :  { %v510_v13 = vpop.f32.mrf.mxu0 }
 0x2e8   :  { %v511_v14 = vadd.f32 %v718_v10, %v510_v13 }
 0x2ea   :  { %514 = vst [vmem:[#allocation13 + $0x8] sm:$0xff] %v511_v14 }
 0x2eb   :  { %527 = dma.vmem_to_hbm [thread:$0]  %s520_s13, 256, %s522_s15, [#allocation4], %s902_s16, %s902_s16, %s903_s17  }
 0x2ec   :  { %895 = dma.done.wait [#allocation4], 256  }
 0x2ed   :  { %896 = vsyncadd [#allocation4], 4294967040 }
 0x2ee   :  { %532 = vsyncpa [#allocation3], 1 }
 0x2ef   :  { %533 = vsyncpa [#allocation6], 1 }
 0x2f0   :  { %534 = vsyncpa [#allocation9], 1 }
 0x2f1   :  { %535 = vsyncpa [#allocation12], 1 }
 0x2f2   :  { %536 = vsyncpa [#allocation4], 1 }

// kernel: tpu_custom_call.1
= control target key start
LH: loop header
LB: loop body
LE: loop exit
PB: predicated region body
PF: predicated region fallthrough
CT: control target
= control target key end

     0   :  { %16 = vsyncpa [#allocation3], 0  ;;  %s1025_s0 = inlined_call_operand.hbm [shape: f32[16,16], index: 0, kind: input, shape index: {}]   ;;  %s1026_s1 = inlined_call_operand.hbm [shape: bf16[16,128], index: 1, kind: input, shape index: {}]   ;;  %s1027_s2 = inlined_call_operand.vmem [shape: f32[1,128], index: 2, kind: input, shape index: {}]   ;;  %s1028_s3 = inlined_call_operand.hbm [shape: bf16[128,128], index: 3, kind: input, shape index: {}]   ;;  %s1029_s4 = inlined_call_operand.vmem [shape: f32[1,128], index: 4, kind: input, shape index: {}]   ;;  %s1030_s5 = inlined_call_operand.hbm [shape: bf16[128,128], index: 5, kind: input, shape index: {}]   ;;  %s1031_s6 = inlined_call_operand.vmem [shape: f32[1,128], index: 6, kind: input, shape index: {}]   ;;  %s1032_s7 = inlined_call_operand.hbm [shape: bf16[128,128], index: 7, kind: input, shape index: {}]   ;;  %s1033_s8 = inlined_call_operand.vmem [shape: f32[1,128], index: 8, kind: input, shape index: {}]   ;;  %s1034_s9 = inlined_call_operand.hbm [shape: bf16[128,128], index: 9, kind: input, shape index: {}]   ;;  %s1035_s10 = inlined_call_operand.vmem [shape: f32[1,128], index: 10, kind: input, shape index: {}]   ;;  %s1036_s11 = inlined_call_operand.hbm [shape: f32[16,128], index: 11, kind: output, shape index: {}]  }
   0x1   :  { %17 = vsyncpa [#allocation6], 0 }
   0x2   :  { %18 = vsyncpa [#allocation9], 0 }
   0x3   :  { %19 = vsyncpa [#allocation12], 0  ;;  %s38_s19 = sshll.u32 %s1026_s1, 4  ;;  %s39_s19 = int_to_ptr.hbm [resolvable:$true] %s38_s19 }
   0x4   :  { %20 = vsyncpa [#allocation4], 0  ;;  %s897_s20 = smov [#allocation5]   ;;  %s68_s24 = sshll.u32 %s1030_s5, 4  ;;  %s69_s24 = int_to_ptr.hbm [resolvable:$true] %s68_s24 }
   0x5   :  { %s40_s21 = sshll.u32 %s897_s20, 4  ;;  %s898_s25 = smov 64   ;;  %s41_s21 = int_to_ptr.vmem [resolvable:$true] %s40_s21 }
   0x6   :  { %s899_s26 = smov 4   ;;  %s900_s27 = smov [#allocation8]  }
   0x7   :  { %46 = dma.hbm_to_vmem [thread:$0]  %s39_s19, 128, %s41_s21, [#allocation6], %s898_s25, %s898_s25, %s899_s26  }
   0x8   :  { %s70_s28 = sshll.u32 %s900_s27, 4  ;;  %s25_s30 = sshll.u32 %s1025_s0, 4  ;;  %s71_s28 = int_to_ptr.vmem [resolvable:$true] %s70_s28  ;;  %s26_s30 = int_to_ptr.hbm [resolvable:$true] %s25_s30 }
   0x9   :  { %76 = dma.hbm_to_vmem [thread:$0]  %s69_s24, 1024, %s71_s28, [#allocation9], %s898_s25, %s898_s25, %s899_s26  }
   0xa   :  { %s901_s5 = smov [#allocation2]   ;;  %s53_s15 = sshll.u32 %s1028_s3, 4  ;;  %s54_s15 = int_to_ptr.hbm [resolvable:$true] %s53_s15 }
   0xb   :  { %s27_s12 = sshll.u32 %s901_s5, 4  ;;  %s902_s16 = smov 128   ;;  %s28_s12 = int_to_ptr.vmem [resolvable:$true] %s27_s12 }
   0xc   :  { %s903_s17 = smov 8   ;;  %s904_s0 = smov [#allocation7]  }
   0xd   :  { %33 = dma.hbm_to_vmem [thread:$0]  %s26_s30, 256, %s28_s12, [#allocation3], %s902_s16, %s902_s16, %s903_s17  }
   0xe   :  { %s55_s18 = sshll.u32 %s904_s0, 4  ;;  %s83_s21 = sshll.u32 %s1032_s7, 4  ;;  %s56_s18 = int_to_ptr.vmem [resolvable:$true] %s55_s18  ;;  %s84_s21 = int_to_ptr.hbm [resolvable:$true] %s83_s21 }
   0xf   :  { %61 = dma.hbm_to_vmem [thread:$0]  %s54_s15, 1024, %s56_s18, [#allocation6], %s898_s25, %s898_s25, %s899_s26  }
  0x10   :  { %s98_s23 = sshll.u32 %s1034_s9, 4  ;;  %s905_s24 = smov [#allocation10]   ;;  %s99_s23 = int_to_ptr.hbm [resolvable:$true] %s98_s23 }
  0x11   :  { %s85_s27 = sshll.u32 %s905_s24, 4  ;;  %s906_s28 = smov [#allocation11]   ;;  %s86_s27 = int_to_ptr.vmem [resolvable:$true] %s85_s27 }
  0x12   :  { %91 = dma.hbm_to_vmem [thread:$0]  %s84_s21, 1024, %s86_s27, [#allocation9], %s898_s25, %s898_s25, %s899_s26  }
  0x13   :  { %s100_s7 = sshll.u32 %s906_s28, 4  ;;  %s101_s7 = int_to_ptr.vmem [resolvable:$true] %s100_s7 }
  0x14   :  { %106 = dma.hbm_to_vmem [thread:$0]  %s99_s23, 1024, %s101_s7, [#allocation12], %s898_s25, %s898_s25, %s899_s26  }
  0x15   :  { %887 = dma.done.wait [#allocation3], 256  }
  0x16   :  { %888 = vsyncadd [#allocation3], 4294967040 }
  0x17   :  { %889 = dma.done.wait [#allocation6], 1152  }
  0x18   :  { %890 = vsyncadd [#allocation6], 4294966144 }
  0x19   :  { %891 = dma.done.wait [#allocation9], 2048  }
  0x1a   :  { %892 = vsyncadd [#allocation9], 4294965248 }
  0x1b   :  { %893 = dma.done.wait [#allocation12], 1024  }
  0x1c   :  { %894 = vsyncadd [#allocation12], 4294966272  ;;  %v670_v0 = vld [vmem:[#allocation5] sm:$0xff]  ;;  %v134_v1 = vld [vmem:[#allocation2] sm:$0xff]  ;;  %vm149_vm0 = vcmask 130048   ;;  %s907_s12 = smov [#allocation13]  }
  0x1d   :  { %v135_v2 = vld [vmem:[#allocation2 + $0x8] sm:$0xff]  ;;  %v678_v4 = vld [vmem:[#allocation7 + $0x38] sm:$0xff]  ;;  %160 = vmatpush.bf16.msra.mxu0 %v670_v0  ;;  %v676_v6 = vld [vmem:[#allocation7 + $0x28] sm:$0xff]  ;;  %s519_s13 = sshll.u32 %s907_s12, 4  ;;  %s521_s15 = sshll.u32 %s1036_s11, 4  ;;  %s520_s13 = int_to_ptr.vmem [resolvable:$true] %s519_s13  ;;  %s522_s15 = int_to_ptr.hbm [resolvable:$true] %s521_s15 }
  0x1e   :  { %v136_v3 = vpack.c.bf16 %v135_v2, %v134_v1  ;;  %v677_v5 = vld [vmem:[#allocation7 + $0x30] sm:$0xff]  ;;  %238 = vmatpush.bf16.msra.mxu1 %v678_v4  ;;  %v675_v7 = vld [vmem:[#allocation7 + $0x20] sm:$0xff]  ;;  %v674_v8 = vld [vmem:[#allocation7 + $0x18] sm:$0xff] }
  0x1f   :  { %v673_v9 = vld [vmem:[#allocation7 + $0x10] sm:$0xff]  ;;  %v672_v10 = vld [vmem:[#allocation7 + $0x8] sm:$0xff]  ;;  %v671_v11 = vld [vmem:[#allocation7] sm:$0xff] }
  0x20   :  { %541 = vmatmul.msk.bf16.vlgmr.msra.gmra.mxu0 %vm149_vm0, %v136_v3  ;;  %v686_v12 = vld [vmem:[#allocation8 + $0x38] sm:$0xff]  ;;  %v685_v13 = vld [vmem:[#allocation8 + $0x30] sm:$0xff]  ;;  %v684_v14 = vld [vmem:[#allocation8 + $0x28] sm:$0xff] }
  0x21   :  { %325 = vmatpush.bf16.msra.mxu2 %v686_v12  ;;  %v683_v15 = vld [vmem:[#allocation8 + $0x20] sm:$0xff]  ;;  %v714_v17 = vld [vmem:[%s1027_s2] ss:$0 sm:$0xff]  ;;  %v682_v24 = vld [vmem:[#allocation8 + $0x18] sm:$0xff] }
  0x22   :  { %239 = vmatpush.bf16.msra.mxu1 %v677_v5  ;;  %v681_v25 = vld [vmem:[#allocation8 + $0x10] sm:$0xff]  ;;  %v680_v26 = vld [vmem:[#allocation8 + $0x8] sm:$0xff]  ;;  %v679_v27 = vld [vmem:[#allocation8] sm:$0xff] }
  0x23   :  { %v694_v28 = vld [vmem:[#allocation10 + $0x38] sm:$0xff]  ;;  %v693_v29 = vld [vmem:[#allocation10 + $0x30] sm:$0xff]  ;;  %v692_v30 = vld [vmem:[#allocation10 + $0x28] sm:$0xff] }
  0x24   :  { %412 = vmatpush.bf16.msra.mxu3 %v694_v28  ;;  %v691_v31 = vld [vmem:[#allocation10 + $0x20] sm:$0xff]  ;;  %v715_v33 = vld [vmem:[%s1029_s4] ss:$0 sm:$0xff]  ;;  %v690_v42 = vld [vmem:[#allocation10 + $0x18] sm:$0xff] }
  0x25   :  { %326 = vmatpush.bf16.msra.mxu2 %v685_v13  ;;  %v689_v43 = vld [vmem:[#allocation10 + $0x10] sm:$0xff]  ;;  %v688_v44 = vld [vmem:[#allocation10 + $0x8] sm:$0xff]  ;;  %v687_v45 = vld [vmem:[#allocation10] sm:$0xff] }
  0x26   :  { %240 = vmatpush.bf16.msra.mxu1 %v676_v6  ;;  %v702_v46 = vld [vmem:[#allocation11 + $0x38] sm:$0xff]  ;;  %v701_v47 = vld [vmem:[#allocation11 + $0x30] sm:$0xff]  ;;  %v700_v48 = vld [vmem:[#allocation11 + $0x28] sm:$0xff] }
  0x27   :  { %499 = vmatpush.bf16.msrb.mxu0 %v702_v46  ;;  %v699_v49 = vld [vmem:[#allocation11 + $0x20] sm:$0xff]  ;;  %v716_v51 = vld [vmem:[%s1031_s6] ss:$0 sm:$0xff]  ;;  %v698_v60 = vld [vmem:[#allocation11 + $0x18] sm:$0xff] }
  0x28   :  { %413 = vmatpush.bf16.msra.mxu3 %v693_v29  ;;  %v697_v61 = vld [vmem:[#allocation11 + $0x10] sm:$0xff]  ;;  %v696_v62 = vld [vmem:[#allocation11 + $0x8] sm:$0xff]  ;;  %v695_v63 = vld [vmem:[#allocation11] sm:$0xff] }
  0x29   :  { %327 = vmatpush.bf16.msra.mxu2 %v684_v14  ;;  %v717_v1 = vld [vmem:[%s1033_s8] ss:$0 sm:$0xff] }
  0x2a   :  { %241 = vmatpush.bf16.msra.mxu1 %v675_v7 }
  0x2b   :  { %500 = vmatpush.bf16.msrb.mxu0 %v701_v47 }
  0x2c   :  { %414 = vmatpush.bf16.msra.mxu3 %v692_v30 }
  0x2d   :  { %328 = vmatpush.bf16.msra.mxu2 %v683_v15 }
  0x2e   :  { %242 = vmatpush.bf16.msra.mxu1 %v674_v8 }
  0x2f   :  { %501 = vmatpush.bf16.msrb.mxu0 %v700_v48 }
  0x30   :  { %415 = vmatpush.bf16.msra.mxu3 %v691_v31 }
  0x31   :  { %329 = vmatpush.bf16.msra.mxu2 %v682_v24 }
  0x32   :  { %243 = vmatpush.bf16.msra.mxu1 %v673_v9 }
  0x33   :  { %502 = vmatpush.bf16.msrb.mxu0 %v699_v49 }
  0x34   :  { %416 = vmatpush.bf16.msra.mxu3 %v690_v42 }
  0x35   :  { %330 = vmatpush.bf16.msra.mxu2 %v681_v25 }
  0x36   :  { %244 = vmatpush.bf16.msra.mxu1 %v672_v10  ;;  %v718_v10 = vld [vmem:[%s1035_s10] ss:$0 sm:$0xff] }
  0x37   :  { %503 = vmatpush.bf16.msrb.mxu0 %v698_v60 }
  0x38   :  { %417 = vmatpush.bf16.msra.mxu3 %v689_v43 }
  0x39   :  { %331 = vmatpush.bf16.msra.mxu2 %v680_v26 }
  0x3a   :  { %245 = vmatpush.bf16.msra.mxu1 %v671_v11 }
  0x3b   :  { %504 = vmatpush.bf16.msrb.mxu0 %v697_v61 }
  0x3c   :  { %418 = vmatpush.bf16.msra.mxu3 %v688_v44 }
  0x3d   :  { %332 = vmatpush.bf16.msra.mxu2 %v679_v27 }
  0x3f   :  { %505 = vmatpush.bf16.msrb.mxu0 %v696_v62 }
  0x40   :  { %419 = vmatpush.bf16.msra.mxu3 %v687_v45 }
  0x43   :  { %506 = vmatpush.bf16.msrb.mxu0 %v695_v63 }
  0x9d   :  { %v162_v16 = vpop.f32.mrf.mxu0 }
  0x9e   :  { %v163_v18 = vadd.f32 %v714_v17, %v162_v16 }
  0xa0   :  { %v167_v21 = vmax.f32 %v163_v18, 0.0 }
  0xa5   :  { %v164_v19 = vpop.f32.mrf.mxu0 }
  0xa6   :  { %v165_v20 = vadd.f32 %v714_v17, %v164_v19 }
  0xa8   :  { %v168_v22 = vmax.f32 %v165_v20, 0.0 }
  0xaa   :  { %v169_v23 = vpack.c.bf16 %v168_v22, %v167_v21 }
  0xac   :  { %246 = vmatmul.bf16.vlgmr.msra.gmra.mxu1 %v169_v23 }
 0x129   :  { %v247_v32 = vpop.f32.mrf.mxu1 }
 0x12a   :  { %v248_v34 = vadd.f32 %v715_v33, %v247_v32 }
 0x12c   :  { %v252_v36 = vmax.f32 %v248_v34, 0.0 }
 0x12e   :  { %v254_v39 = vadd.f32 %v252_v36, %v167_v21 }
 0x131   :  { %v249_v35 = vpop.f32.mrf.mxu1 }
 0x132   :  { %v250_v37 = vadd.f32 %v715_v33, %v249_v35 }
 0x134   :  { %v253_v38 = vmax.f32 %v250_v37, 0.0 }
 0x136   :  { %v255_v40 = vadd.f32 %v253_v38, %v168_v22 }
 0x138   :  { %v256_v41 = vpack.c.bf16 %v255_v40, %v254_v39 }
 0x13a   :  { %333 = vmatmul.bf16.vlgmr.msra.gmra.mxu2 %v256_v41 }
 0x1bd   :  { %v334_v50 = vpop.f32.mrf.mxu2 }
 0x1be   :  { %v335_v52 = vadd.f32 %v716_v51, %v334_v50 }
 0x1c0   :  { %v339_v54 = vmax.f32 %v335_v52, 0.0 }
 0x1c2   :  { %v341_v57 = vadd.f32 %v339_v54, %v254_v39 }
 0x1c5   :  { %v336_v53 = vpop.f32.mrf.mxu2 }
 0x1c6   :  { %v337_v55 = vadd.f32 %v716_v51, %v336_v53 }
 0x1c8   :  { %v340_v56 = vmax.f32 %v337_v55, 0.0 }
 0x1ca   :  { %v342_v58 = vadd.f32 %v340_v56, %v255_v40 }
 0x1cc   :  { %v343_v59 = vpack.c.bf16 %v342_v58, %v341_v57 }
 0x1ce   :  { %420 = vmatmul.bf16.vlgmr.msra.gmra.mxu3 %v343_v59 }
 0x251   :  { %v421_v0 = vpop.f32.mrf.mxu3 }
 0x252   :  { %v422_v2 = vadd.f32 %v717_v1, %v421_v0 }
 0x254   :  { %v426_v4 = vmax.f32 %v422_v2, 0.0 }
 0x256   :  { %v428_v7 = vadd.f32 %v426_v4, %v341_v57 }
 0x259   :  { %v423_v3 = vpop.f32.mrf.mxu3 }
 0x25a   :  { %v424_v5 = vadd.f32 %v717_v1, %v423_v3 }
 0x25c   :  { %v427_v6 = vmax.f32 %v424_v5, 0.0 }
 0x25e   :  { %v429_v8 = vadd.f32 %v427_v6, %v342_v58 }
 0x260   :  { %v430_v9 = vpack.c.bf16 %v429_v8, %v428_v7 }
 0x262   :  { %507 = vmatmul.bf16.vlgmr.msrb.gmra.mxu0 %v430_v9 }
 0x2df   :  { %v508_v11 = vpop.f32.mrf.mxu0 }
 0x2e0   :  { %v509_v12 = vadd.f32 %v718_v10, %v508_v11 }
 0x2e2   :  { %513 = vst [vmem:[#allocation13] sm:$0xff] %v509_v12 }
 0x2e7   :  { %v510_v13 = vpop.f32.mrf.mxu0 }
 0x2e8   :  { %v511_v14 = vadd.f32 %v718_v10, %v510_v13 }
 0x2ea   :  { %514 = vst [vmem:[#allocation13 + $0x8] sm:$0xff] %v511_v14 }
 0x2eb   :  { %527 = dma.vmem_to_hbm [thread:$0]  %s520_s13, 256, %s522_s15, [#allocation4], %s902_s16, %s902_s16, %s903_s17  }
 0x2ec   :  { %895 = dma.done.wait [#allocation4], 256  }
 0x2ed   :  { %896 = vsyncadd [#allocation4], 4294967040 }
 0x2ee   :  { %532 = vsyncpa [#allocation3], 1 }
 0x2ef   :  { %533 = vsyncpa [#allocation6], 1 }
 0x2f0   :  { %534 = vsyncpa [#allocation9], 1 }
 0x2f1   :  { %535 = vsyncpa [#allocation12], 1 }
 0x2f2   :  { %536 = vsyncpa [#allocation4], 1 }

</bundles_post_ra>
